<compile_context>
chip_gen: v7x
topology: tpu7x:2x2x1
jax: 0.10.0
libtpu: 0.0.40
codegen_flags: <defaults>
</compile_context>

<pallas_src>
import functools

import jax
import jax.numpy as jnp
from jax.experimental import pallas as pl
from jax.experimental.pallas import tpu as pltpu

_LANE = 128
_SUBLANE = 8
_ACC_ROWS = 32                       # accumulator sublanes -> 4 independent vregs
_TARGET_BLOCK_BYTES = 2 * 1024 * 1024  # per input per grid step
_NCORES = 2                          # v7x megacore split; sequential elsewhere
_MIN_PALLAS_ELEMS = 64 * 1024        # below this, fused XLA reduce beats launch cost
_PAD_LOGIT = -1e9                    # BCE contribution of (x=-1e9, y=0) is exactly 0


def _vmem_limit_bytes():
    # 48 MiB on v7x (64 MiB physical), up to 96 MiB on v5e/v6e (128 MiB physical).
    try:
        cap = pltpu.get_tpu_info().vmem_capacity_bytes
        return int(min(max(cap - (16 << 20), 32 << 20), 96 << 20))
    except Exception:
        return 48 << 20


def _bce_logits_mean_kernel(x_ref, y_ref, out_ref, acc_ref, *,
                            inv_n, rows_total, needs_mask):
    """grid = (cores, steps); acc_ref is a (32,128) f32 VMEM running partial sum."""
    step = pl.program_id(1)

    @pl.when(step == 0)
    def _init():
        acc_ref[...] = jnp.zeros_like(acc_ref)

    # In-kernel upcast so sub-32-bit inputs stream HBM->VMEM at native width.
    x = x_ref[...].astype(jnp.float32)
    y = y_ref[...].astype(jnp.float32)
    # Numerically stable BCE-with-logits (matches PyTorch's formulation).
    per = jnp.maximum(x, 0.0) - x * y + jnp.log1p(jnp.exp(-jnp.abs(x)))

    br = per.shape[0]
    if needs_mask:
        # Mask rows past the end of the (rows_total, 128) array: covers the ragged
        # last block AND the clamped duplicate block of the core-split overshoot.
        # Done AFTER exp/log1p so NaN/Inf garbage in OOB rows cannot leak through
        # the select.
        block_idx = pl.program_id(0) * pl.num_programs(1) + step
        row_ids = block_idx * br + jax.lax.broadcasted_iota(jnp.int32, (br, _LANE), 0)
        per = jnp.where(row_ids < rows_total, per, 0.0)

    # Fold block rows into a few vreg-shaped partial sums: pure VPU adds per step
    # (hidden under DMA); the single cross-lane reduce is deferred to the last step.
    if br >= _ACC_ROWS and br % _ACC_ROWS == 0:
        acc_ref[...] += jnp.sum(per.reshape(br // _ACC_ROWS, _ACC_ROWS, _LANE), axis=0)
    else:
        # Small single-block case (block_rows == rows, may not divide 32).
        acc_ref[0:1, :] += jnp.sum(per, axis=0, keepdims=True)

    @pl.when(step == pl.num_programs(1) - 1)
    def _finalize():
        out_ref[0, 0] = jnp.sum(acc_ref[...]) * inv_n


def _bce_pallas(x_flat, y_flat, n):
    itemsize = max(jnp.dtype(x_flat.dtype).itemsize, jnp.dtype(y_flat.dtype).itemsize)
    max_block_rows = max(_SUBLANE,
                         (_TARGET_BLOCK_BYTES // (_LANE * itemsize)) // _SUBLANE * _SUBLANE)

    rows = pl.cdiv(n, _LANE)
    pad = rows * _LANE - n
    if pad:
        # Only when n % 128 != 0: pad just to the next lane multiple with values
        # whose BCE contribution is exactly 0 (x=-1e9, y=0), so inv_n stays 1/n.
        # TODO(synk): a 1-D BlockSpec over the raw flat array would avoid this copy.
        x_flat = jnp.pad(x_flat, (0, pad), constant_values=_PAD_LOGIT)
        y_flat = jnp.pad(y_flat, (0, pad), constant_values=0)
    # Free bitcast when pad == 0 (the common case) -> zero extra HBM traffic.
    x2 = x_flat.reshape(rows, _LANE)
    y2 = y_flat.reshape(rows, _LANE)

    if rows <= max_block_rows:
        block_rows = rows            # full-dim block (allowed even if % 8 != 0)
        ncores, steps, total_blocks = 1, 1, 1
    else:
        block_rows = max_block_rows
        total_blocks = pl.cdiv(rows, block_rows)
        ncores = _NCORES if total_blocks >= 4 else 1
        steps = pl.cdiv(total_blocks, ncores)

    needs_mask = (ncores * steps * block_rows) != rows
    last_block = total_blocks - 1

    def in_map(c, i):
        # Clamp so the (at most one) overshoot block of the core split re-reads a
        # valid block instead of DMA-ing out of bounds; it is fully masked in-kernel.
        return (jnp.minimum(c * steps + i, last_block), 0)

    kernel = functools.partial(_bce_logits_mean_kernel, inv_n=1.0 / n,
                               rows_total=rows, needs_mask=needs_mask)

    partials = pl.pallas_call(
        kernel,
        out_shape=jax.ShapeDtypeStruct((ncores, 1), jnp.float32),
        grid_spec=pltpu.PrefetchScalarGridSpec(
            num_scalar_prefetch=0,
            grid=(ncores, steps),
            in_specs=[
                pl.BlockSpec((block_rows, _LANE), in_map),
                pl.BlockSpec((block_rows, _LANE), in_map),
            ],
            out_specs=pl.BlockSpec((1, 1), lambda c, i: (c, 0),
                                   memory_space=pltpu.SMEM),
            scratch_shapes=[pltpu.VMEM((_ACC_ROWS, _LANE), jnp.float32)],
        ),
        compiler_params=pltpu.CompilerParams(
            dimension_semantics=("parallel", "arbitrary"),
            vmem_limit_bytes=_vmem_limit_bytes(),
        ),
    )(x2, y2)
    # Per-core partials already carry the 1/n scale; summing them gives the mean.
    return jnp.sum(partials)


def _bce_reference(x, y):
    x = x.astype(jnp.float32)
    y = y.astype(jnp.float32)
    return jnp.mean(jnp.maximum(x, 0.0) - x * y + jnp.log1p(jnp.exp(-jnp.abs(x))))


def bce_with_logits_mean(logits, targets, *, force_pallas=False):
    """Mean-reduced BCEWithLogitsLoss over arbitrarily-shaped inputs."""
    assert logits.shape == targets.shape
    n = logits.size
    if (not force_pallas) and n < _MIN_PALLAS_ELEMS:
        # Kernel launch overhead dwarfs the work at tiny sizes.
        return _bce_reference(logits, targets)
    return _bce_pallas(logits.reshape(-1), targets.reshape(-1), n)


def my_criterion(input_dict):
    """JAX/Pallas equivalent of MyCriterion.forward."""
    return bce_with_logits_mean(input_dict["output"], input_dict["same_class"])


if __name__ == "__main__":
    key = jax.random.PRNGKey(0)
    k1, k2, k3, k4, k5, k6 = jax.random.split(key, 6)

    # Small shape consistent with the module (elementwise over any shape); n = 2048
    # is a multiple of 128 -> the no-copy reshape path.
    shape = (2, 4, 16, 16)
    logits = jax.random.normal(k1, shape, dtype=jnp.float32)
    same_class = jax.random.bernoulli(k2, p=0.5, shape=shape).astype(jnp.float32)

    loss_mod = jax.block_until_ready(
        my_criterion({"output": logits, "same_class": same_class}))
    loss_kernel = jax.block_until_ready(
        bce_with_logits_mean(logits, same_class, force_pallas=True))
    ref = _bce_reference(logits, same_class)
    assert jnp.allclose(loss_kernel, ref, rtol=1e-5, atol=1e-6), (loss_kernel, ref)
    assert jnp.allclose(loss_mod, ref, rtol=1e-5, atol=1e-6), (loss_mod, ref)

    # Multi-block bf16 case: 5 real blocks (ragged last block), 2-core split with
    # one clamped + fully-masked overshoot block; n is a multiple of 128 so no pad
    # copy occurs.
    shape2 = (33101, 128)
    logits2 = jax.random.normal(k3, shape2, dtype=jnp.bfloat16)
    targets2 = jax.random.bernoulli(k4, p=0.5, shape=shape2).astype(jnp.bfloat16)
    loss2 = jax.block_until_ready(
        bce_with_logits_mean(logits2, targets2, force_pallas=True))
    ref2 = _bce_reference(logits2, targets2)
    assert jnp.allclose(loss2, ref2, rtol=1e-4, atol=1e-4), (loss2, ref2)

    # Ragged n (not a multiple of 128): exercises the tiny tail-pad fallback and
    # the small single-block accumulation path.
    shape3 = (7, 9, 13)
    logits3 = jax.random.normal(k5, shape3, dtype=jnp.float32)
    targets3 = jax.random.bernoulli(k6, p=0.5, shape=shape3).astype(jnp.float32)
    loss3 = jax.block_until_ready(
        bce_with_logits_mean(logits3, targets3, force_pallas=True))
    ref3 = _bce_reference(logits3, targets3)
    assert jnp.allclose(loss3, ref3, rtol=1e-5, atol=1e-6), (loss3, ref3)

    print("KERNEL_OK")
</pallas_src>

<mosaic_0001>
module attributes {stable_mosaic.version = 11 : i64} {
  func.func @_bce_logits_mean_kernel(%arg0: i32, %arg1: i32, %arg2: memref<16x128xf32, #tpu.memory_space<vmem>>, %arg3: memref<16x128xf32, #tpu.memory_space<vmem>>, %arg4: memref<1x1xf32, #tpu.memory_space<smem>>, %arg5: memref<32x128xf32, #tpu.memory_space<vmem>>) attributes {dimension_semantics = [#tpu.dimension_semantics<parallel>, #tpu.dimension_semantics<arbitrary>], iteration_bounds = array<i64: 1, 1>, scalar_prefetch = 0 : i64, scratch_operands = 1 : i64, tpu.core_type = #tpu.core_type<tc>, window_params = [{transform_indices = @transform_0, window_bounds = array<i64: 16, 128>}, {transform_indices = @transform_1, window_bounds = array<i64: 16, 128>}, {transform_indices = @transform_2, window_bounds = array<i64: 1, 1>}]} {
    %c0_i32 = arith.constant 0 : i32
    %0 = arith.cmpi eq, %arg1, %c0_i32 : i32
    %1 = arith.extui %0 : i1 to i32
    %c0_i32_0 = arith.constant 0 : i32
    %2 = arith.cmpi ne, %1, %c0_i32_0 : i32
    scf.if %2 {
      %cst_12 = arith.constant 0.000000e+00 : f32
      %23 = vector.broadcast %cst_12 : f32 to vector<32x128xf32>
      %c0_13 = arith.constant 0 : index
      %c0_14 = arith.constant 0 : index
      %24 = vector.load %arg5[%c0_13, %c0_14] : memref<32x128xf32, #tpu.memory_space<vmem>>, vector<32x128xf32>
      tpu.vector_store %arg5[%c0_13, %c0_14], %23 {strides = array<i32>} : memref<32x128xf32, #tpu.memory_space<vmem>>, vector<32x128xf32>,
    } else {
    }
    %c0 = arith.constant 0 : index
    %c0_1 = arith.constant 0 : index
    %3 = vector.load %arg2[%c0, %c0_1] : memref<16x128xf32, #tpu.memory_space<vmem>>, vector<16x128xf32>
    %c0_2 = arith.constant 0 : index
    %c0_3 = arith.constant 0 : index
    %4 = vector.load %arg3[%c0_2, %c0_3] : memref<16x128xf32, #tpu.memory_space<vmem>>, vector<16x128xf32>
    %cst = arith.constant 0.000000e+00 : f32
    %5 = vector.broadcast %cst : f32 to vector<16x128xf32>
    %6 = arith.maximumf %3, %5 : vector<16x128xf32>
    %7 = arith.mulf %3, %4 : vector<16x128xf32>
    %8 = arith.subf %6, %7 : vector<16x128xf32>
    %9 = math.absf %3 : vector<16x128xf32>
    %cst_4 = arith.constant 0.000000e+00 : f32
    %10 = vector.broadcast %cst_4 : f32 to vector<16x128xf32>
    %11 = arith.subf %10, %9 : vector<16x128xf32>
    %12 = math.exp %11 : vector<16x128xf32>
    %13 = math.log1p %12 : vector<16x128xf32>
    %14 = arith.addf %8, %13 : vector<16x128xf32>
    %c0_5 = arith.constant 0 : index
    %c0_6 = arith.constant 0 : index
    %15 = vector.load %arg5[%c0_5, %c0_6] : memref<32x128xf32, #tpu.memory_space<vmem>>, vector<1x128xf32>
    %cst_7 = arith.constant dense<0.000000e+00> : vector<128xf32>
    %16 = vector.multi_reduction <add>, %14, %cst_7 [0] : vector<16x128xf32> to vector<128xf32>
    %17 = vector.shape_cast %16 : vector<128xf32> to vector<1x128xf32>
    %18 = arith.addf %15, %17 : vector<1x128xf32>
    %c0_8 = arith.constant 0 : index
    %c0_9 = arith.constant 0 : index
    %19 = vector.load %arg5[%c0_8, %c0_9] : memref<32x128xf32, #tpu.memory_space<vmem>>, vector<1x128xf32>
    tpu.vector_store %arg5[%c0_8, %c0_9], %18 {strides = array<i32>} : memref<32x128xf32, #tpu.memory_space<vmem>>, vector<1x128xf32>,
    %c0_i32_10 = arith.constant 0 : i32
    %20 = arith.cmpi eq, %arg1, %c0_i32_10 : i32
    %21 = arith.extui %20 : i1 to i32
    %c0_i32_11 = arith.constant 0 : i32
    %22 = arith.cmpi ne, %21, %c0_i32_11 : i32
    scf.if %22 {
      %c0_12 = arith.constant 0 : index
      %c0_13 = arith.constant 0 : index
      %23 = vector.load %arg5[%c0_12, %c0_13] : memref<32x128xf32, #tpu.memory_space<vmem>>, vector<32x128xf32>
      %24 = vector.shape_cast %23 : vector<32x128xf32> to vector<1x32x128xf32>
      %cst_14 = arith.constant dense<0.000000e+00> : vector<1xf32>
      %25 = vector.multi_reduction <add>, %24, %cst_14 [1, 2] : vector<1x32x128xf32> to vector<1xf32>
      %26 = vector.shape_cast %25 : vector<1xf32> to vector<1x1x1xf32>
      %27 = vector.extract %26[0, 0, 0] : f32 from vector<1x1x1xf32>
      %cst_15 = arith.constant 4.8828125E-4 : f32
      %28 = arith.mulf %27, %cst_15 : f32
      %c0_16 = arith.constant 0 : index
      %c0_17 = arith.constant 0 : index
      %29 = memref.load %arg4[%c0_16, %c0_17] : memref<1x1xf32, #tpu.memory_space<smem>>
      memref.store %28, %arg4[%c0_16, %c0_17] : memref<1x1xf32, #tpu.memory_space<smem>>
    } else {
    }
    return
  }
  func.func @transform_0(%arg0: i32, %arg1: i32) -> (i32, i32) {
    %c1_i32 = arith.constant 1 : i32
    %0 = arith.muli %arg0, %c1_i32 : i32
    %1 = arith.addi %0, %arg1 : i32
    %c0_i32 = arith.constant 0 : i32
    %2 = arith.minsi %1, %c0_i32 : i32
    %c0_i32_0 = arith.constant 0 : i32
    %c0_i32_1 = arith.constant 0 : i32
    return %2, %c0_i32_0 : i32, i32
  }
  func.func @transform_1(%arg0: i32, %arg1: i32) -> (i32, i32) {
    %c1_i32 = arith.constant 1 : i32
    %0 = arith.muli %arg0, %c1_i32 : i32
    %1 = arith.addi %0, %arg1 : i32
    %c0_i32 = arith.constant 0 : i32
    %2 = arith.minsi %1, %c0_i32 : i32
    %c0_i32_0 = arith.constant 0 : i32
    %c0_i32_1 = arith.constant 0 : i32
    return %2, %c0_i32_0 : i32, i32
  }
  func.func @transform_2(%arg0: i32, %arg1: i32) -> (i32, i32) {
    %c0_i32 = arith.constant 0 : i32
    %c0_i32_0 = arith.constant 0 : i32
    return %arg0, %c0_i32 : i32, i32
  }
}

</mosaic_0001>

<bundles_post_ra>
// kernel: tpu_custom_call.1
= control target key start
LH: loop header
LB: loop body
LE: loop exit
PB: predicated region body
PF: predicated region fallthrough
CT: control target
= control target key end

     0   :  { %7 = vsyncpa [#allocation4], 0  ;;  %s290_s0 = inlined_call_operand.hbm [shape: f32[16,128], index: 0, kind: input, shape index: {}]   ;;  %s291_s1 = inlined_call_operand.hbm [shape: f32[16,128], index: 1, kind: input, shape index: {}]   ;;  %s292_s2 = inlined_call_operand.hbm [shape: f32[1,1], index: 2, kind: output, shape index: {}]  }
   0x1   :  { %8 = vsyncpa [#allocation7], 0 }
   0x2   :  { %9 = vsyncpa [#allocation5], 0  ;;  %s233_s9 = smov [#allocation3]   ;;  %s173_s13 = scalar_lea.hbm %s290_s0, 256 }
   0x3   :  { %s21_s10 = sshll.u32 %s233_s9, 4  ;;  %p174_p0 = scmp.ne.s32.totalorder %s290_s0, %s173_s13  ;;  %s22_s10 = int_to_ptr.vmem [resolvable:$true] %s21_s10 }
   0x4   :  { %p177_p1 = scmp.lt.u32.totalorder %s173_s13, %s290_s0 }
   0x6   :  { %p179_p2 = pnand %p177_p1, %p174_p0 }
   0x8   :  { %182 = shalt.err (!%p179_p2)
}
   0x9   :  { %s183_s18 = scalar_lea.vmem %s22_s10, 256  ;;  %p188_p4 = scmp.lt.s32.totalorder %s22_s10, %s22_s10 }
   0xa   :  { %p184_p3 = scmp.ne.s32.totalorder %s22_s10, %s183_s18  ;;  %p189_p5 = scmp.lt.s32.totalorder %s183_s18, %s183_s18 }
   0xc   :  { %p190_p6 = por %p189_p5, %p188_p4 }
   0xe   :  { %p191_p7 = pnand %p190_p6, %p184_p3 }
  0x10   :  { %194 = shalt.err (!%p191_p7)
}
  0x11   :  { %s234_s19 = smov 128   ;;  %s235_s20 = smov 8  }
  0x12   :  { %27 = dma.hbm_to_vmem [thread:$0]  %s290_s0, 256, %s22_s10, [#allocation4], %s234_s19, %s234_s19, %s235_s20  }
  0x13   :  { %s236_s23 = smov [#allocation6]   ;;  %s195_s27 = scalar_lea.hbm %s291_s1, 256 }
  0x14   :  { %s39_s24 = sshll.u32 %s236_s23, 4  ;;  %p196_p8 = scmp.ne.s32.totalorder %s291_s1, %s195_s27  ;;  %s40_s24 = int_to_ptr.vmem [resolvable:$true] %s39_s24 }
  0x15   :  { %p199_p9 = scmp.lt.u32.totalorder %s195_s27, %s291_s1 }
  0x17   :  { %p201_p10 = pnand %p199_p9, %p196_p8 }
  0x19   :  { %204 = shalt.err (!%p201_p10)
}
  0x1a   :  { %s205_s4 = scalar_lea.vmem %s40_s24, 256  ;;  %p210_p12 = scmp.lt.s32.totalorder %s40_s24, %s40_s24 }
  0x1b   :  { %p206_p11 = scmp.ne.s32.totalorder %s40_s24, %s205_s4  ;;  %p211_p13 = scmp.lt.s32.totalorder %s205_s4, %s205_s4 }
  0x1d   :  { %p212_p0 = por %p211_p13, %p210_p12 }
  0x1f   :  { %p213_p1 = pnand %p212_p0, %p206_p11 }
  0x21   :  { %216 = shalt.err (!%p213_p1)
}
  0x22   :  { %45 = dma.hbm_to_vmem [thread:$0]  %s291_s1, 256, %s40_s24, [#allocation7], %s234_s19, %s234_s19, %s235_s20  }
  0x23   :  { %227 = dma.done.wait [#allocation4], 256  }
  0x24   :  { %228 = vsyncadd [#allocation4], 4294967040 }
  0x25   :  { %229 = dma.done.wait [#allocation7], 256  }
  0x26   :  { %230 = vsyncadd [#allocation7], 4294967040  ;;  %v237_v0 = vmov 0.0   ;;  %v68_v1 = vld [vmem:[#allocation3] sm:$0xff]  ;;  %v69_v2 = vld [vmem:[#allocation3 + $0x8] sm:$0xff]  ;;  %s217_s9 = scalar_lea.hbm %s292_s2, 16 }
  0x27   :  { %64 = vst [vmem:[#allocation2] sm:$0xff] %v237_v0  ;;  %v78_v3 = vand.u32 2147483647, %v68_v1  ;;  %v79_v4 = vand.u32 2147483647, %v69_v2  ;;  %v70_v15 = vld [vmem:[#allocation6] sm:$0xff]  ;;  %p218_p2 = scmp.ne.s32.totalorder %s292_s2, %s217_s9  ;;  %p221_p3 = scmp.lt.u32.totalorder %s217_s9, %s292_s2 }
  0x28   :  { %v71_v16 = vld [vmem:[#allocation6 + $0x8] sm:$0xff]  ;;  %v72_v18 = vmax.f32 %v68_v1, 0.0  ;;  %v74_v19 = vmul.f32 %v70_v15, %v68_v1  ;;  %v73_v22 = vmax.f32 %v69_v2, 0.0 }
  0x29   :  { %v80_v5 = vsub.f32 0.0, %v78_v3  ;;  %v81_v6 = vsub.f32 0.0, %v79_v4  ;;  %v75_v23 = vmul.f32 %v71_v16, %v69_v2  ;;  %p223_p4 = pnand %p221_p3, %p218_p2 }
  0x2a   :  { %v76_v27 = vsub.f32 %v72_v18, %v74_v19 }
  0x2b   :  { %v82_v7 = vmul.f32 1.442695, %v80_v5  ;;  %v84_v8 = vmul.f32 1.442695, %v81_v6  ;;  %v77_v30 = vsub.f32 %v73_v22, %v75_v23 }
  0x2d   :  { %165 = vpow2.f32 %v82_v7 }
  0x2e   :  { %167 = vpow2.f32 %v84_v8  ;;  %v106_v43 = vld [vmem:[#allocation2] sm:$0x1] }
  0x37   :  { %v166_v9 = vpop.eup %165 }
  0x38   :  { %v168_v10 = vpop.eup %167  ;;  %v86_v11 = vadd.f32 1.0, %v166_v9  ;;  %v89_v13 = vmul.f32 -0.5, %v166_v9  ;;  %v92_v20 = vand.u32 2147483647, %v166_v9 }
  0x39   :  { %v95_v12 = vadd.f32 1.0, %v168_v10  ;;  %v98_v14 = vmul.f32 -0.5, %v168_v10  ;;  %v101_v24 = vand.u32 2147483647, %v168_v10 }
  0x3a   :  { %169 = vlog2.f32 %v86_v11  ;;  %v90_v17 = vadd.f32 1.0, %v89_v13  ;;  %vm93_vm0 = vcmp.lt.f32.partialorder %v92_v20, 0.0004427343 }
  0x3b   :  { %171 = vlog2.f32 %v95_v12  ;;  %v99_v21 = vadd.f32 1.0, %v98_v14  ;;  %vm102_vm1 = vcmp.lt.f32.partialorder %v101_v24, 0.0004427343 }
  0x3c   :  { %v91_v25 = vmul.f32 %v166_v9, %v90_v17 }
  0x3d   :  { %v100_v28 = vmul.f32 %v168_v10, %v99_v21 }
  0x44   :  { %v170_v26 = vpop.eup %169 }
  0x45   :  { %v172_v29 = vpop.eup %171  ;;  %v88_v31 = vmul.f32 0.6931472, %v170_v26 }
  0x46   :  { %v97_v32 = vmul.f32 0.6931472, %v172_v29 }
  0x47   :  { %v94_v33 = vsel %vm93_vm0, %v91_v25, %v88_v31 }
  0x48   :  { %v103_v34 = vsel %vm102_vm1, %v100_v28, %v97_v32  ;;  %v104_v35 = vadd.f32 %v94_v33, %v76_v27 }
  0x49   :  { %v105_v36 = vadd.f32 %v103_v34, %v77_v30 }
  0x4b   :  { %v107_v37 = vadd.f32 %v105_v36, %v104_v35 }
  0x4d   :  { %v108_v38 = vrot.slane %v107_v37, 4 }
  0x4f   :  { %v109_v39 = vadd.f32 %v108_v38, %v107_v37 }
  0x51   :  { %v110_v40 = vrot.slane %v109_v39, 2 }
  0x53   :  { %v111_v41 = vadd.f32 %v110_v40, %v109_v39 }
  0x55   :  { %v112_v42 = vrot.slane %v111_v41, 1 }
  0x57   :  { %v113_v44 = vadd.f32 %v112_v42, %v111_v41 }
  0x59   :  { %v114_v45 = vadd.f32 %v113_v44, %v106_v43 }
  0x5b   :  { %115 = vst [vmem:[#allocation2] sm:$0x1] %v114_v45 }
  0x62   :  { %v119_v46 = vld [vmem:[#allocation2] sm:$0xff] }
  0x63   :  { %126 = vadd.xlane.f32.xlu0 %v119_v46 }
  0xf0   :  { %v127_v47 = vpop.xlane.xlu0 %126 }
  0xf1   :  { %v128_v48 = vrot.slane %v127_v47, 4 }
  0xf3   :  { %v129_v49 = vadd.f32 %v128_v48, %v127_v47 }
  0xf5   :  { %v130_v50 = vrot.slane %v129_v49, 2 }
  0xf7   :  { %v131_v51 = vadd.f32 %v130_v50, %v129_v49 }
  0xf9   :  { %v132_v52 = vrot.slane %v131_v51, 1 }
  0xfb   :  { %v133_v53 = vadd.f32 %v132_v52, %v131_v51 }
  0xfd   :  { %157 = vpush %v133_v53 }
 0x12e   :  { %s158_s1 = spop %157 }
 0x12f   :  { %s135_s6 = smul.f32 0.00048828125, %s158_s1 }
 0x131   :  { %137 = sst [smem:[#allocation8]] %s135_s6 }
 0x132   :  { %226 = shalt.err (!%p223_p4)
}
 0x133   :  { %s238_s14 = smov [#allocation8]  }
 0x134   :  { %145 = dma.smem_to_hbm %s238_s14, 16, %s292_s2, [#allocation5]  }
 0x135   :  { %231 = dma.done.wait [#allocation5], 16  }
 0x136   :  { %232 = vsyncadd [#allocation5], 4294967280 }
 0x137   :  { %149 = sfence }
 0x138   :  { %150 = vsyncpa [#allocation4], 1 }
 0x139   :  { %151 = vsyncpa [#allocation7], 1 }
 0x13a   :  { %152 = vsyncpa [#allocation5], 1 }

</bundles_post_ra>
